<compile_context>
chip_gen: v6e
topology: v6e:2x2x1
jax: 0.10.0
libtpu: 0.0.40
codegen_flags: <defaults>
</compile_context>

<pallas_src>
import functools

import jax
import jax.numpy as jnp
from jax.experimental import pallas as pl
from jax.experimental.pallas import tpu as pltpu

_LANE = 128
_MIB = 1024 * 1024


def _cross_attention_kernel(a_ref, b_ref, ma_ref, mb_ref, cva_ref, cvb_ref,
                            *, mxu_dtype):
    a = a_ref[...]          # (Bt, LA, Dp) compute dtype (bf16 or f32)
    b = b_ref[...]          # (Bt, LB, Dp)
    ma = ma_ref[...]        # (Bt, LA, 1)  f32, 1 = keep, 0 = masked
    mb = mb_ref[...]        # (Bt, 1,  LB) f32

    a_mx = a.astype(mxu_dtype)
    b_mx = b.astype(mxu_dtype)

    # scores[b, i, j] = <A[b, i, :], B[b, j, :]>
    # Transposed contraction via dimension numbers (no materialized B^T);
    # bf16 operands feed the MXU natively, accumulation is f32.
    scores = jnp.einsum("bid,bjd->bij", a_mx, b_mx,
                        preferred_element_type=jnp.float32)      # (Bt, LA, LB)

    # masked_fill(mask == 0, -1e9) with mask = maskA[:, :, None] * maskB[:, None, :],
    # as two broadcast selects with a Python-float fill value (no captured
    # array constant, no (LA, LB) mask tensor).  Exact PyTorch semantics:
    # fully-masked rows/cols become exactly -1e9 -> uniform attention.
    scores = jnp.where(mb == 0, -1.0e9, scores)
    scores = jnp.where(ma == 0, -1.0e9, scores)

    # ---------------- A side: softmax over LA (axis 1), cvA = attnA^T @ A ----
    eA = jnp.exp(scores - jnp.max(scores, axis=1, keepdims=True))
    attnA = eA * pl.reciprocal(jnp.sum(eA, axis=1, keepdims=True), approx=True)
    # cvA[b, j, d] = sum_i attnA[b, i, j] * A[b, i, d]  (no in-memory transpose)
    cva = jnp.einsum("bij,bid->bjd", attnA.astype(mxu_dtype), a_mx,
                     preferred_element_type=jnp.float32)
    cva_ref[...] = cva.astype(cva_ref.dtype)

    # ---------------- B side: softmax over LB (axis 2), cvB = attnB @ B ------
    eB = jnp.exp(scores - jnp.max(scores, axis=2, keepdims=True))
    attnB = eB * pl.reciprocal(jnp.sum(eB, axis=2, keepdims=True), approx=True)
    cvb = jnp.einsum("bij,bjd->bid", attnB.astype(mxu_dtype), b_mx,
                     preferred_element_type=jnp.float32)
    cvb_ref[...] = cvb.astype(cvb_ref.dtype)


def _hw_params():
    """Generation-aware budgets.  Proxy: 64 MiB VMEM => v7x-class (2 TCs)."""
    vmem_bytes = 128 * _MIB
    try:
        info = pltpu.get_tpu_info()
        vmem_bytes = int(getattr(info, "vmem_capacity_bytes", vmem_bytes))
    except Exception:
        # Non-TPU backend / interpret mode: keep conservative defaults.
        pass
    if vmem_bytes <= 64 * _MIB:
        # v7x: 64 MiB VMEM per TC, 2 TensorCores -> smaller blocks, even grid.
        return {"num_cores": 2, "block_budget": 14 * _MIB,
                "vmem_limit": 40 * _MIB}
    # v5e / v6e: 128 MiB VMEM, single TensorCore -> biggest resident block.
    return {"num_cores": 1, "block_budget": 48 * _MIB,
            "vmem_limit": int(min(96 * _MIB, vmem_bytes - 16 * _MIB))}


def _per_batch_vmem_bytes(la, lb, dp, in_bytes, out_bytes):
    """Estimated VMEM bytes per packed batch element (pipeline + live set)."""
    io = 2 * in_bytes * (la + lb) * dp          # double-buffered input blocks
    io += 2 * out_bytes * (la + lb) * dp        # double-buffered output blocks
    io += 2 * 4 * (la + lb)                     # mask blocks (f32, tiny)
    inter = 4 * 4 * la * lb                     # ~4 live f32 (LA, LB) tensors
    inter += 2 * 2 * la * lb                    # bf16 copies of attn weights
    inter += 4 * (la + lb) * dp                 # f32 cv accumulators pre-cast
    return io + inter


def _choose_batch_tile(batch, per_batch_bytes, budget_bytes, num_cores):
    """Pick how many batch elements to pack per grid step."""
    cap = max(1, budget_bytes // max(per_batch_bytes, 1))
    candidates = [bt for bt in range(1, batch + 1)
                  if batch % bt == 0 and bt <= cap]
    if not candidates:
        return 1  # TODO(synk): flash tiling needed when even Bt=1 overflows.
    if num_cores <= 1:
        # Single TensorCore: splitting buys nothing; biggest block wins.
        return max(candidates)
    # Multi-TC (megacore): prefer an even split across cores, then enough
    # steps per core for the pipeline to reach steady state, then larger Bt.
    best_key, best_bt = None, 1
    for bt in candidates:
        steps = batch // bt
        key = (steps % num_cores == 0, steps >= 2 * num_cores, bt)
        if best_key is None or key > best_key:
            best_key, best_bt = key, bt
    return best_bt


def cross_attention(inputA, inputB, maskA=None, maskB=None,
                    *, mxu_dtype=jnp.bfloat16, out_dtype=None):
    """Pallas TPU implementation of CrossAttention.forward.

    inputA: (B, LA, D), inputB: (B, LB, D); optional maskA (B, LA), maskB (B, LB).
    Returns (cvA, cvB) with shapes (B, LB, D) and (B, LA, D).
    """
    B, LA, D = inputA.shape
    Bb, LB, Db = inputB.shape
    assert B == Bb and D == Db

    out_dtype = inputA.dtype if out_dtype is None else out_dtype

    if maskA is None or maskB is None:
        maskA_f = jnp.ones((B, LA), jnp.float32)
        maskB_f = jnp.ones((B, LB), jnp.float32)
    else:
        maskA_f = maskA.astype(jnp.float32)
        maskB_f = maskB.astype(jnp.float32)

    # Input blocks carried in the MXU dtype when it's bf16 (halves DMA/VMEM);
    # otherwise keep the original dtype.
    if jnp.dtype(mxu_dtype) == jnp.dtype(jnp.bfloat16):
        in_dtype = jnp.bfloat16
    else:
        in_dtype = inputA.dtype

    # Lane-dense feature dim: pad D to a multiple of 128 so output stores are
    # full-lane (unmasked) stores; zero padding is mathematically exact and
    # sliced off afterwards.  Cast is fused into the same copy.
    Dp = ((D + _LANE - 1) // _LANE) * _LANE
    a_in = inputA.astype(in_dtype)
    b_in = inputB.astype(in_dtype)
    if Dp != D:
        pad = ((0, 0), (0, 0), (0, Dp - D))
        a_in = jnp.pad(a_in, pad)
        b_in = jnp.pad(b_in, pad)

    ma = maskA_f.reshape(B, LA, 1)
    mb = maskB_f.reshape(B, 1, LB)

    hw = _hw_params()
    in_bytes = jnp.dtype(in_dtype).itemsize
    out_bytes = jnp.dtype(out_dtype).itemsize
    per_batch = _per_batch_vmem_bytes(LA, LB, Dp, in_bytes, out_bytes)
    Bt = _choose_batch_tile(B, per_batch, hw["block_budget"], hw["num_cores"])
    # TODO(synk): flash-style tiling over LA/LB (online softmax per side) when
    # even Bt=1 exceeds the per-generation VMEM budget.
    grid = (B // Bt,)

    kernel = functools.partial(_cross_attention_kernel, mxu_dtype=mxu_dtype)

    grid_spec = pltpu.PrefetchScalarGridSpec(
        num_scalar_prefetch=0,
        grid=grid,
        in_specs=[
            pl.BlockSpec((Bt, LA, Dp), lambda i: (i, 0, 0)),
            pl.BlockSpec((Bt, LB, Dp), lambda i: (i, 0, 0)),
            pl.BlockSpec((Bt, LA, 1), lambda i: (i, 0, 0)),
            pl.BlockSpec((Bt, 1, LB), lambda i: (i, 0, 0)),
        ],
        out_specs=[
            pl.BlockSpec((Bt, LB, Dp), lambda i: (i, 0, 0)),
            pl.BlockSpec((Bt, LA, Dp), lambda i: (i, 0, 0)),
        ],
    )

    # Advisory cost estimate so XLA schedules the surrounding pad / slice ops
    # sensibly around the custom call.
    cost = pl.CostEstimate(
        flops=3 * 2 * B * LA * LB * Dp,
        transcendentals=2 * B * LA * LB,
        bytes_accessed=(in_bytes * B * (LA + LB) * Dp
                        + 4 * B * (LA + LB)
                        + out_bytes * B * (LA + LB) * Dp),
    )

    cvA_p, cvB_p = pl.pallas_call(
        kernel,
        out_shape=(
            jax.ShapeDtypeStruct((B, LB, Dp), out_dtype),
            jax.ShapeDtypeStruct((B, LA, Dp), out_dtype),
        ),
        grid_spec=grid_spec,
        compiler_params=pltpu.CompilerParams(
            dimension_semantics=("parallel",),
            vmem_limit_bytes=hw["vmem_limit"],
        ),
        cost_estimate=cost,
    )(a_in, b_in, ma, mb)

    if Dp != D:
        cvA_p = cvA_p[..., :D]
        cvB_p = cvB_p[..., :D]
    return cvA_p, cvB_p


def _reference(inputA, inputB, maskA, maskB):
    scores = jnp.einsum("bld,bmd->blm", inputA, inputB)
    mask = maskA[:, :, None] * maskB[:, None, :]
    scores = jnp.where(mask == 0, -1.0e9, scores)
    attnA = jax.nn.softmax(scores, axis=1)
    attnB = jax.nn.softmax(scores, axis=2)
    cvA = jnp.einsum("blm,bld->bmd", attnA, inputA)
    cvB = jnp.einsum("blm,bmd->bld", attnB, inputB)
    return cvA, cvB


if __name__ == "__main__":
    key = jax.random.PRNGKey(0)
    kA, kB, kMA, kMB = jax.random.split(key, 4)

    B, LA, LB, D = 2, 8, 8, 32
    inputA = jax.random.normal(kA, (B, LA, D), dtype=jnp.float32)
    inputB = jax.random.normal(kB, (B, LB, D), dtype=jnp.float32)
    # deterministic binary masks (1 = keep, 0 = masked)
    maskA = (jax.random.uniform(kMA, (B, LA)) > 0.2).astype(jnp.float32)
    maskB = (jax.random.uniform(kMB, (B, LB)) > 0.2).astype(jnp.float32)

    refA, refB = _reference(inputA, inputB, maskA, maskB)

    # Default (performance) path: bf16 input blocks / MXU operands, f32 acc.
    cvA, cvB = cross_attention(inputA, inputB, maskA, maskB)
    cvA = jax.block_until_ready(cvA)
    cvB = jax.block_until_ready(cvB)
    assert cvA.shape == (B, LB, D) and cvB.shape == (B, LA, D)
    # bf16 operand rounding gives ~1e-2-level deviation from the f32 reference.
    assert jnp.allclose(cvA, refA, atol=1.5e-1, rtol=1.5e-1), "cvA (bf16 MXU) mismatch"
    assert jnp.allclose(cvB, refB, atol=1.5e-1, rtol=1.5e-1), "cvB (bf16 MXU) mismatch"

    # Exact-semantics path (f32 MXU operands) for a tight correctness check
    # (remaining differences: approx reciprocal, accumulation order).
    cvA32, cvB32 = cross_attention(inputA, inputB, maskA, maskB,
                                   mxu_dtype=jnp.float32)
    cvA32 = jax.block_until_ready(cvA32)
    cvB32 = jax.block_until_ready(cvB32)
    assert jnp.allclose(cvA32, refA, atol=2e-2, rtol=2e-2), "cvA (f32 MXU) mismatch"
    assert jnp.allclose(cvB32, refB, atol=2e-2, rtol=2e-2), "cvB (f32 MXU) mismatch"

    print("KERNEL_OK")
</pallas_src>

<mosaic_0001>
module attributes {stable_mosaic.version = 11 : i64} {
  func.func @_cross_attention_kernel(%arg0: i32, %arg1: memref<2x8x128xbf16, #tpu.memory_space<vmem>>, %arg2: memref<2x8x128xbf16, #tpu.memory_space<vmem>>, %arg3: memref<2x8x1xf32, #tpu.memory_space<vmem>>, %arg4: memref<2x1x8xf32, #tpu.memory_space<vmem>>, %arg5: memref<2x8x128xf32, #tpu.memory_space<vmem>>, %arg6: memref<2x8x128xf32, #tpu.memory_space<vmem>>) attributes {dimension_semantics = [#tpu.dimension_semantics<parallel>], iteration_bounds = array<i64: 1>, scalar_prefetch = 0 : i64, scratch_operands = 0 : i64, tpu.core_type = #tpu.core_type<tc>, window_params = [{transform_indices = @transform_0, window_bounds = array<i64: 2, 8, 128>}, {transform_indices = @transform_1, window_bounds = array<i64: 2, 8, 128>}, {transform_indices = @transform_2, window_bounds = array<i64: 2, 8, 1>}, {transform_indices = @transform_3, window_bounds = array<i64: 2, 1, 8>}, {transform_indices = @transform_4, window_bounds = array<i64: 2, 8, 128>}, {transform_indices = @transform_5, window_bounds = array<i64: 2, 8, 128>}]} {
    %c0 = arith.constant 0 : index
    %c0_0 = arith.constant 0 : index
    %c0_1 = arith.constant 0 : index
    %0 = vector.load %arg1[%c0, %c0_0, %c0_1] : memref<2x8x128xbf16, #tpu.memory_space<vmem>>, vector<2x8x128xbf16>
    %c0_2 = arith.constant 0 : index
    %c0_3 = arith.constant 0 : index
    %c0_4 = arith.constant 0 : index
    %1 = vector.load %arg2[%c0_2, %c0_3, %c0_4] : memref<2x8x128xbf16, #tpu.memory_space<vmem>>, vector<2x8x128xbf16>
    %c0_5 = arith.constant 0 : index
    %c0_6 = arith.constant 0 : index
    %c0_7 = arith.constant 0 : index
    %2 = vector.load %arg3[%c0_5, %c0_6, %c0_7] : memref<2x8x1xf32, #tpu.memory_space<vmem>>, vector<2x8x1xf32>
    %c0_8 = arith.constant 0 : index
    %c0_9 = arith.constant 0 : index
    %c0_10 = arith.constant 0 : index
    %3 = vector.load %arg4[%c0_8, %c0_9, %c0_10] : memref<2x1x8xf32, #tpu.memory_space<vmem>>, vector<2x1x8xf32>
    "tpu.trace_start"() <{level = 10 : i32, message = "bid,bjd->bij"}> : () -> ()
    %cst = arith.constant dense<0.000000e+00> : vector<2x8x8xf32>
    %4 = tpu.matmul %0, %1, %cst {dimension_numbers = #tpu.dot_dimension_numbers<[2], [2], [1], [1], [0, 0, 0, 1, 1, 1], [0], [0]>} : vector<2x8x128xbf16>, vector<2x8x128xbf16>, vector<2x8x8xf32> -> vector<2x8x8xf32>
    %cst_11 = arith.constant 0.000000e+00 : f32
    "tpu.trace_stop"() : () -> ()
    %5 = vector.broadcast %cst_11 : f32 to vector<2x1x8xf32>
    %6 = arith.cmpf oeq, %3, %5 : vector<2x1x8xf32>
    %cst_12 = arith.constant -1.000000e+09 : f32
    %7 = vector.shape_cast %6 : vector<2x1x8xi1> to vector<2x1x8xi1>
    %8 = vector.broadcast %7 : vector<2x1x8xi1> to vector<2x8x8xi1>
    %9 = vector.broadcast %cst_12 : f32 to vector<2x8x8xf32>
    %10 = arith.select %8, %9, %4 : vector<2x8x8xi1>, vector<2x8x8xf32>
    %cst_13 = arith.constant 0.000000e+00 : f32
    %11 = vector.broadcast %cst_13 : f32 to vector<2x8x1xf32>
    %12 = arith.cmpf oeq, %2, %11 : vector<2x8x1xf32>
    %cst_14 = arith.constant -1.000000e+09 : f32
    %13 = vector.shape_cast %12 : vector<2x8x1xi1> to vector<2x8x1xi1>
    %14 = vector.broadcast %13 : vector<2x8x1xi1> to vector<2x8x8xi1>
    %15 = vector.broadcast %cst_14 : f32 to vector<2x8x8xf32>
    %16 = arith.select %14, %15, %10 : vector<2x8x8xi1>, vector<2x8x8xf32>
    %cst_15 = arith.constant dense<0xFF800000> : vector<2x8xf32>
    %17 = vector.multi_reduction <maximumf>, %16, %cst_15 [1] : vector<2x8x8xf32> to vector<2x8xf32>
    %18 = vector.shape_cast %17 : vector<2x8xf32> to vector<2x1x8xf32>
    %19 = vector.broadcast %18 : vector<2x1x8xf32> to vector<2x8x8xf32>
    %20 = arith.subf %16, %19 : vector<2x8x8xf32>
    %21 = math.exp %20 : vector<2x8x8xf32>
    %cst_16 = arith.constant dense<0.000000e+00> : vector<2x8xf32>
    %22 = vector.multi_reduction <add>, %21, %cst_16 [1] : vector<2x8x8xf32> to vector<2x8xf32>
    %23 = vector.shape_cast %22 : vector<2x8xf32> to vector<2x1x8xf32>
    %24 = tpu.reciprocal %23 {approx = true} : vector<2x1x8xf32> -> vector<2x1x8xf32>
    %25 = vector.broadcast %24 : vector<2x1x8xf32> to vector<2x8x8xf32>
    %26 = arith.mulf %21, %25 : vector<2x8x8xf32>
    %27 = arith.truncf %26 : vector<2x8x8xf32> to vector<2x8x8xbf16>
    "tpu.trace_start"() <{level = 10 : i32, message = "bij,bid->bjd"}> : () -> ()
    %cst_17 = arith.constant dense<0.000000e+00> : vector<2x8x128xf32>
    %28 = tpu.matmul %27, %0, %cst_17 {dimension_numbers = #tpu.dot_dimension_numbers<[1], [1], [2], [2], [0, 0, 0, 2, 1, 2], [0], [0]>} : vector<2x8x8xbf16>, vector<2x8x128xbf16>, vector<2x8x128xf32> -> vector<2x8x128xf32>
    "tpu.trace_stop"() : () -> ()
    %c0_18 = arith.constant 0 : index
    %c0_19 = arith.constant 0 : index
    %c0_20 = arith.constant 0 : index
    %29 = vector.load %arg5[%c0_18, %c0_19, %c0_20] : memref<2x8x128xf32, #tpu.memory_space<vmem>>, vector<2x8x128xf32>
    tpu.vector_store %arg5[%c0_18, %c0_19, %c0_20], %28 {strides = array<i32>} : memref<2x8x128xf32, #tpu.memory_space<vmem>>, vector<2x8x128xf32>,
    %cst_21 = arith.constant dense<0xFF800000> : vector<2x8xf32>
    %30 = vector.multi_reduction <maximumf>, %16, %cst_21 [2] : vector<2x8x8xf32> to vector<2x8xf32>
    %31 = vector.shape_cast %30 : vector<2x8xf32> to vector<2x8x1xf32>
    %32 = vector.broadcast %31 : vector<2x8x1xf32> to vector<2x8x8xf32>
    %33 = arith.subf %16, %32 : vector<2x8x8xf32>
    %34 = math.exp %33 : vector<2x8x8xf32>
    %cst_22 = arith.constant dense<0.000000e+00> : vector<2x8xf32>
    %35 = vector.multi_reduction <add>, %34, %cst_22 [2] : vector<2x8x8xf32> to vector<2x8xf32>
    %36 = vector.shape_cast %35 : vector<2x8xf32> to vector<2x8x1xf32>
    %37 = tpu.reciprocal %36 {approx = true} : vector<2x8x1xf32> -> vector<2x8x1xf32>
    %38 = vector.broadcast %37 : vector<2x8x1xf32> to vector<2x8x8xf32>
    %39 = arith.mulf %34, %38 : vector<2x8x8xf32>
    %40 = arith.truncf %39 : vector<2x8x8xf32> to vector<2x8x8xbf16>
    "tpu.trace_start"() <{level = 10 : i32, message = "bij,bjd->bid"}> : () -> ()
    %cst_23 = arith.constant dense<0.000000e+00> : vector<2x8x128xf32>
    %41 = tpu.matmul %40, %1, %cst_23 {dimension_numbers = #tpu.dot_dimension_numbers<[2], [1], [1], [2], [0, 0, 0, 1, 1, 2], [0], [0]>} : vector<2x8x8xbf16>, vector<2x8x128xbf16>, vector<2x8x128xf32> -> vector<2x8x128xf32>
    "tpu.trace_stop"() : () -> ()
    %c0_24 = arith.constant 0 : index
    %c0_25 = arith.constant 0 : index
    %c0_26 = arith.constant 0 : index
    %42 = vector.load %arg6[%c0_24, %c0_25, %c0_26] : memref<2x8x128xf32, #tpu.memory_space<vmem>>, vector<2x8x128xf32>
    tpu.vector_store %arg6[%c0_24, %c0_25, %c0_26], %41 {strides = array<i32>} : memref<2x8x128xf32, #tpu.memory_space<vmem>>, vector<2x8x128xf32>,
    return
  }
  func.func @transform_0(%arg0: i32) -> (i32, i32, i32) {
    %c0_i32 = arith.constant 0 : i32
    %c0_i32_0 = arith.constant 0 : i32
    %c0_i32_1 = arith.constant 0 : i32
    return %arg0, %c0_i32, %c0_i32_0 : i32, i32, i32
  }
  func.func @transform_1(%arg0: i32) -> (i32, i32, i32) {
    %c0_i32 = arith.constant 0 : i32
    %c0_i32_0 = arith.constant 0 : i32
    %c0_i32_1 = arith.constant 0 : i32
    return %arg0, %c0_i32, %c0_i32_0 : i32, i32, i32
  }
  func.func @transform_2(%arg0: i32) -> (i32, i32, i32) {
    %c0_i32 = arith.constant 0 : i32
    %c0_i32_0 = arith.constant 0 : i32
    %c0_i32_1 = arith.constant 0 : i32
    return %arg0, %c0_i32, %c0_i32_0 : i32, i32, i32
  }
  func.func @transform_3(%arg0: i32) -> (i32, i32, i32) {
    %c0_i32 = arith.constant 0 : i32
    %c0_i32_0 = arith.constant 0 : i32
    %c0_i32_1 = arith.constant 0 : i32
    return %arg0, %c0_i32, %c0_i32_0 : i32, i32, i32
  }
  func.func @transform_4(%arg0: i32) -> (i32, i32, i32) {
    %c0_i32 = arith.constant 0 : i32
    %c0_i32_0 = arith.constant 0 : i32
    %c0_i32_1 = arith.constant 0 : i32
    return %arg0, %c0_i32, %c0_i32_0 : i32, i32, i32
  }
  func.func @transform_5(%arg0: i32) -> (i32, i32, i32) {
    %c0_i32 = arith.constant 0 : i32
    %c0_i32_0 = arith.constant 0 : i32
    %c0_i32_1 = arith.constant 0 : i32
    return %arg0, %c0_i32, %c0_i32_0 : i32, i32, i32
  }
}

</mosaic_0001>

<bundles_post_ra>
// kernel: tpu_custom_call.1
= control target key start
LH: loop header
LB: loop body
LE: loop exit
PB: predicated region body
PF: predicated region fallthrough
CT: control target
= control target key end

     0   :  { %11 = vsyncpa [#allocation3], 0  ;;  %vm200_vm0 = vcmask 1043456   ;;  %v576_v2 = vmov 0.0   ;;  %vm577_vm1 = vmmov 0   ;;  %s681_s0 = inlined_call_operand.vmem [shape: bf16[2,8,128], index: 0, kind: input, shape index: {}]   ;;  %s682_s1 = inlined_call_operand.vmem [shape: bf16[2,8,128], index: 1, kind: input, shape index: {}]   ;;  %s683_s2 = inlined_call_operand.vmem [shape: f32[2,8,1], index: 2, kind: input, shape index: {}]   ;;  %s684_s3 = inlined_call_operand.vmem [shape: f32[2,1,8], index: 3, kind: input, shape index: {}]   ;;  %s685_s4 = inlined_call_operand.hbm [shape: f32[2,8,128], index: 4, kind: output, shape index: {0}]   ;;  %s686_s5 = inlined_call_operand.hbm [shape: f32[2,8,128], index: 5, kind: output, shape index: {1}]  }
   0x1   :  { %v24_v0 = vld [vmem:[%s682_s1] sm:$0xf]  ;;  %v25_v1 = vld [vmem:[%s682_s1 + $0x4] sm:$0xf]  ;;  %472 = vmatprep.subr.bf16.mxu0 %v576_v2  ;;  %478 = vmatprep.subr.bf16.mxu1 %v576_v2  ;;  %v27_v6 = vld [vmem:[%s683_s2 + $0x8] sm:$0xff] }
   0x2   :  { %v622_v3 = vsel %vm200_vm0, %v24_v0, 0  ;;  %v625_v4 = vsel %vm200_vm0, %v25_v1, 0  ;;  %473 = vmatpush3.bf16.xpose.msra.mxu0 %v24_v0  ;;  %479 = vmatpush3.bf16.xpose.msra.mxu1 %v25_v1  ;;  %v26_v5 = vld [vmem:[%s683_s2] sm:$0xff] }
   0x3   :  { %474 = vmatprep.mubr.msk.bf16.mxu0 %vm577_vm1, %v576_v2  ;;  %480 = vmatprep.mubr.msk.bf16.mxu1 %vm577_vm1, %v576_v2  ;;  %vm126_vm2 = vcmp.eq.f32.partialorder %v26_v5, 0.0 }
   0x4   :  { %12 = vsyncpa [#allocation5], 0  ;;  %v578_v7 = vmov 0   ;;  %vm127_vm3 = vcmp.eq.f32.partialorder %v27_v6, 0.0  ;;  %490 = vmatprep.subr.bf16.mxu1 %v576_v2  ;;  %484 = vmatprep.subr.bf16.mxu0 %v576_v2  ;;  %v22_v9 = vld [vmem:[%s681_s0] sm:$0xf]  ;;  %v114_v14 = vlaneseq }
   0x5   :  { %515 = vset.pattern.permute.xlu0 %v578_v7  ;;  %v128_v8 = vsel %vm126_vm2, 1, %v578_v7  ;;  %v23_v10 = vld [vmem:[%s681_s0 + $0x4] sm:$0xf]  ;;  %v129_v12 = vsel %vm127_vm3, 1, %v578_v7  ;;  %v202_v13 = vsel %vm200_vm0, %v22_v9, 0  ;;  %vm140_vm9 = vcmask 64512  }
   0x6   :  { %131 = vperm.xlu0 %515, %v128_v8   ;;  %v264_v11 = vsel %vm200_vm0, %v23_v10, 0  ;;  %v28_v15 = vld [vmem:[%s684_s3] sm:$0x1]  ;;  %v29_v16 = vld [vmem:[%s684_s3 + $0x1] sm:$0x1]  ;;  %v115_v17 = vshrl.u32 %v114_v14, 7 }
   0x7   :  { %vm110_vm4 = vcmp.eq.f32.partialorder %v28_v15, 0.0  ;;  %vm111_vm5 = vcmp.eq.f32.partialorder %v29_v16, 0.0  ;;  %s579_s3 = smov [#allocation2]  }
   0x8   :  { %v116_v18 = vsub.s32 0, %v115_v17  ;;  %v112_v19 = vsel %vm110_vm4, 1, %v578_v7  ;;  %v113_v20 = vsel %vm111_vm5, 1, %v578_v7  ;;  %s429_s6 = sshll.u32 %s579_s3, 4  ;;  %s430_s6 = int_to_ptr.vmem [resolvable:$true] %s429_s6 }
   0x9   :  { %475 = vmatmul.mubr.bf16.vlgmr.msra.gmra.mxu0 %v22_v9  ;;  %481 = vmatmul.mubr.bf16.vlgmr.msra.gmra.mxu1 %v23_v10  ;;  %s532_s7 = scalar_lea.vmem %s430_s6, 256  ;;  %p537_p1 = scmp.lt.s32.totalorder %s430_s6, %s430_s6 }
   0xa   :  { %134 = vperm.xlu0 %515, %v129_v12   ;;  %491 = vmatpush3.bf16.msra.mxu1 %v264_v11  ;;  %v117_v22 = vrot.slane %v112_v19, %v116_v18  ;;  %v121_v23 = vrot.slane %v113_v20, %v116_v18  ;;  %p533_p0 = scmp.ne.s32.totalorder %s430_s6, %s532_s7  ;;  %p538_p2 = scmp.lt.s32.totalorder %s532_s7, %s532_s7 }
   0xb   :  { %485 = vmatpush3.bf16.msra.mxu0 %v202_v13  ;;  %492 = vmatprep.mubr.msk.bf16.mxu1 %vm577_vm1, %v576_v2 }
   0xc   :  { %486 = vmatprep.mubr.msk.bf16.mxu0 %vm577_vm1, %v576_v2  ;;  %496 = vmatprep.subr.bf16.mxu0 %v576_v2  ;;  %vm122_vm6 = vcmp.eq.s32.totalorder %v117_v22, 1  ;;  %vm123_vm7 = vcmp.eq.s32.totalorder %v121_v23, 1  ;;  %p539_p3 = por %p538_p2, %p537_p1 }
   0xd   :  { %502 = vmatprep.subr.bf16.mxu1 %v576_v2 }
   0xe   :  { %p540_p4 = pnand %p539_p3, %p533_p0 }
  0x81   :  { %v132_v21 = vpop.permute.xlu0 %131 }
  0x82   :  { %vm136_vm8 = vcmp.eq.s32.totalorder %v132_v21, 1 }
  0x85   :  { %v135_v24 = vpop.permute.xlu0 %134 }
  0x86   :  { %vm137_vm10 = vcmp.eq.s32.totalorder %v135_v24, 1 }
  0xc9   :  { %v64_v25 = vpop.f32.mrf.mxu0  ;;  %v104_v26 = vpop.f32.mrf.mxu1 }
  0xca   :  { %v124_v27 = vsel %vm122_vm6, -1e+09, %v64_v25  ;;  %v125_v28 = vsel %vm123_vm7, -1e+09, %v104_v26 }
  0xcb   :  { %v138_v29 = vsel %vm136_vm8, -1e+09, %v124_v27  ;;  %v476_v30 = vpop.f32.mrf.mxu0  ;;  %v482_v31 = vpop.f32.mrf.mxu1  ;;  %v139_v33 = vsel %vm137_vm10, -1e+09, %v125_v28 }
  0xcc   :  { %v141_v32 = vsel %vm140_vm9, %v138_v29, -inf  ;;  %v148_v38 = vsel %vm140_vm9, %v139_v33, -inf }
  0xcd   :  { %v107_v34 = vpop.f32.mrf.mxu1  ;;  %308 = vmax.xlane.f32.xlu1 %v141_v32  ;;  %v67_v35 = vpop.f32.mrf.mxu0  ;;  %v149_v39 = vrot.slane %v148_v38, 4  ;;  %v142_v40 = vrot.slane %v141_v32, 4 }
  0xcf   :  { %v477_v36 = vpop.f32.mrf.mxu0  ;;  %v483_v37 = vpop.f32.mrf.mxu1  ;;  %v150_v41 = vmax.f32 %v148_v38, %v149_v39  ;;  %v143_v42 = vmax.f32 %v141_v32, %v142_v40 }
  0xd1   :  { %310 = vmax.xlane.f32.xlu1 %v148_v38  ;;  %v151_v43 = vrot.slane %v150_v41, 2  ;;  %v144_v44 = vrot.slane %v143_v42, 2 }
  0xd3   :  { %v152_v45 = vmax.f32 %v150_v41, %v151_v43  ;;  %v145_v46 = vmax.f32 %v143_v42, %v144_v44 }
  0xd5   :  { %v153_v47 = vrot.slane %v152_v45, 1  ;;  %v146_v48 = vrot.slane %v145_v46, 1 }
  0xd7   :  { %v154_v49 = vmax.f32 %v152_v45, %v153_v47  ;;  %v147_v50 = vmax.f32 %v145_v46, %v146_v48 }
  0xd9   :  { %v156_v51 = vsub.f32 %v139_v33, %v154_v49  ;;  %v155_v52 = vsub.f32 %v138_v29, %v147_v50 }
  0xdb   :  { %v159_v53 = vmul.f32 1.442695, %v156_v51  ;;  %v157_v54 = vmul.f32 1.442695, %v155_v52 }
  0xdd   :  { %516 = vpow2.f32 %v159_v53 }
  0xde   :  { %518 = vpow2.f32 %v157_v54 }
  0xea   :  { %v517_v61 = vpop.eup %516 }
  0xeb   :  { %v168_v62 = vsel %vm140_vm9, %v517_v61, 0.0  ;;  %v519_v63 = vpop.eup %518 }
  0xec   :  { %v169_v5 = vrot.slane %v168_v62, 4  ;;  %v161_v6 = vsel %vm140_vm9, %v519_v63, 0.0 }
  0xed   :  { %v162_v10 = vrot.slane %v161_v6, 4 }
  0xee   :  { %v170_v9 = vadd.f32 %v169_v5, %v168_v62 }
  0xef   :  { %v163_v12 = vadd.f32 %v162_v10, %v161_v6 }
  0xf0   :  { %v171_v11 = vrot.slane %v170_v9, 2 }
  0xf1   :  { %v164_v14 = vrot.slane %v163_v12, 2 }
  0xf2   :  { %v172_v13 = vadd.f32 %v171_v11, %v170_v9 }
  0xf3   :  { %v165_v16 = vadd.f32 %v164_v14, %v163_v12 }
  0xf4   :  { %v173_v15 = vrot.slane %v172_v13, 1 }
  0xf5   :  { %v166_v18 = vrot.slane %v165_v16, 1 }
  0xf6   :  { %v174_v17 = vadd.f32 %v173_v15, %v172_v13 }
  0xf7   :  { %v167_v19 = vadd.f32 %v166_v18, %v165_v16 }
 0x156   :  { %v309_v55 = vpop.xlane.xlu1 %308 }
 0x157   :  { %v312_v56 = vsub.f32 %v138_v29, %v309_v55 }
 0x159   :  { %v314_v57 = vmul.f32 1.442695, %v312_v56 }
 0x15a   :  { %v311_v58 = vpop.xlane.xlu1 %310 }
 0x15b   :  { %520 = vpow2.f32 %v314_v57  ;;  %v313_v59 = vsub.f32 %v139_v33, %v311_v58 }
 0x15d   :  { %v316_v60 = vmul.f32 1.442695, %v313_v59 }
 0x15f   :  { %522 = vpow2.f32 %v316_v60 }
 0x160   :  { %524 = vrcp.f32 %v174_v17 }
 0x161   :  { %526 = vrcp.f32 %v167_v19 }
 0x168   :  { %v521_v0 = vpop.eup %520 }
 0x169   :  { %v318_v1 = vsel %vm140_vm9, %v521_v0, 0.0 }
 0x16a   :  { %319 = vadd.xlane.f32.xlu0 %v318_v1 }
 0x16c   :  { %v523_v7 = vpop.eup %522 }
 0x16d   :  { %v321_v8 = vsel %vm140_vm9, %v523_v7, 0.0  ;;  %v525_v20 = vpop.eup %524 }
 0x16e   :  { %322 = vadd.xlane.f32.xlu1 %v321_v8  ;;  %v178_v21 = vmul.f32 %v525_v20, %v517_v61  ;;  %v527_v22 = vpop.eup %526 }
 0x16f   :  { %v177_v24 = vmul.f32 %v527_v22, %v519_v63 }
 0x170   :  { %v180_v23 = vpack.c.bf16 %v178_v21, %v178_v21 }
 0x171   :  { %v179_v25 = vpack.c.bf16 %v177_v24, %v177_v24 }
 0x197   :  { %244 = vxpose.xlu0.c.b16.start.end [1/1] (short) (narrow) %v180_v23, 16 }
 0x19b   :  { %181 = vxpose.xlu1.c.b16.start.end [1/1] (short) (narrow) %v179_v25, 16 }
 0x1f3   :  { %v320_v26 = vpop.xlane.xlu0 %319 }
 0x1f4   :  { %528 = vrcp.f32 %v320_v26 }
 0x1f7   :  { %v323_v27 = vpop.xlane.xlu1 %322 }
 0x1f8   :  { %530 = vrcp.f32 %v323_v27 }
 0x1f9   :  { %v252_v28 = vpop.trf.xlu0 }
 0x1fa   :  { %493 = vmatmul.mubr.msk.bf16.vlgmr.msra.gmra.mxu1 %vm140_vm9, %v252_v28 }
 0x1fb   :  { %503 = vmatpush3.bf16.msra.mxu1 %v625_v4  ;;  %504 = vmatprep.mubr.msk.bf16.mxu1 %vm577_vm1, %v576_v2 }
 0x1fd   :  { %v189_v29 = vpop.trf.xlu1 }
 0x1fe   :  { %487 = vmatmul.mubr.msk.bf16.vlgmr.msra.gmra.mxu0 %vm140_vm9, %v189_v29 }
 0x1ff   :  { %497 = vmatpush3.bf16.msra.mxu0 %v622_v3  ;;  %498 = vmatprep.mubr.msk.bf16.mxu0 %vm577_vm1, %v576_v2 }
 0x201   :  { %v529_v30 = vpop.eup %528 }
 0x202   :  { %v326_v31 = vmul.f32 %v529_v30, %v521_v0 }
 0x204   :  { %v328_v32 = vpack.c.bf16 %v326_v31, %v326_v31 }
 0x205   :  { %v531_v33 = vpop.eup %530 }
 0x206   :  { %499 = vmatmul.mubr.msk.bf16.vlgmr.msra.gmra.mxu0 %vm140_vm9, %v328_v32  ;;  %v327_v34 = vmul.f32 %v531_v33, %v523_v7 }
 0x208   :  { %v329_v35 = vpack.c.bf16 %v327_v34, %v327_v34 }
 0x20a   :  { %505 = vmatmul.mubr.msk.bf16.vlgmr.msra.gmra.mxu1 %vm140_vm9, %v329_v35 }
 0x2ba   :  { %v300_v4 = vpop.f32.mrf.mxu1 }
 0x2bb   :  { %307 = vst [vmem:[#allocation2 + $0x8] sm:$0xff] %v300_v4 }
 0x2bc   :  { %v494_v36 = vpop.f32.mrf.mxu1 }
 0x2be   :  { %v238_v3 = vpop.f32.mrf.mxu0  ;;  %v303_v37 = vpop.f32.mrf.mxu1 }
 0x2bf   :  { %306 = vst [vmem:[#allocation2] sm:$0xff] %v238_v3 }
 0x2c0   :  { %v488_v2 = vpop.f32.mrf.mxu0  ;;  %v495_v38 = vpop.f32.mrf.mxu1 }
 0x2c1   :  { %543 = shalt.err (!%p540_p4)
}
 0x2c2   :  { %s580_s8 = smov 128   ;;  %s581_s9 = smov 8   ;;  %v241_v39 = vpop.f32.mrf.mxu0 }
 0x2c3   :  { %435 = dma.vmem_to_hbm [thread:$0]  %s430_s6, 256, %s685_s4, [#allocation3], %s580_s8, %s580_s8, %s581_s9  }
 0x2c4   :  { %v489_v40 = vpop.f32.mrf.mxu0  ;;  %s582_s12 = smov [#allocation4]  }
 0x2c5   :  { %s441_s13 = sshll.u32 %s582_s12, 4  ;;  %s442_s13 = int_to_ptr.vmem [resolvable:$true] %s441_s13 }
 0x2c6   :  { %v370_v41 = vpop.f32.mrf.mxu0  ;;  %s552_s14 = scalar_lea.vmem %s442_s13, 256  ;;  %p557_p6 = scmp.lt.s32.totalorder %s442_s13, %s442_s13 }
 0x2c7   :  { %422 = vst [vmem:[#allocation4] sm:$0xff] %v370_v41  ;;  %p553_p5 = scmp.ne.s32.totalorder %s442_s13, %s552_s14  ;;  %p558_p7 = scmp.lt.s32.totalorder %s552_s14, %s552_s14 }
 0x2c8   :  { %v500_v42 = vpop.f32.mrf.mxu0 }
 0x2c9   :  { %p559_p8 = por %p558_p7, %p557_p6 }
 0x2ca   :  { %v373_v43 = vpop.f32.mrf.mxu0  ;;  %v416_v44 = vpop.f32.mrf.mxu1 }
 0x2cb   :  { %423 = vst [vmem:[#allocation4 + $0x8] sm:$0xff] %v416_v44  ;;  %p560_p9 = pnand %p559_p8, %p553_p5 }
 0x2cc   :  { %v501_v45 = vpop.f32.mrf.mxu0  ;;  %v506_v46 = vpop.f32.mrf.mxu1 }
 0x2cd   :  { %563 = shalt.err (!%p560_p9)
}
 0x2ce   :  { %447 = dma.vmem_to_hbm [thread:$0]  %s442_s13, 256, %s686_s5, [#allocation5], %s580_s8, %s580_s8, %s581_s9   ;;  %v419_v47 = vpop.f32.mrf.mxu1 }
 0x2d0   :  { %v507_v48 = vpop.f32.mrf.mxu1 }
 0x2d1   :  { %572 = dma.done.wait [#allocation3], 256  }
 0x2d2   :  { %573 = vsyncadd [#allocation3], 4294967040 }
 0x2d3   :  { %574 = dma.done.wait [#allocation5], 256  }
 0x2d4   :  { %575 = vsyncadd [#allocation5], 4294967040 }
 0x2d5   :  { %454 = vsyncpa [#allocation3], 1 }
 0x2d6   :  { %455 = vsyncpa [#allocation5], 1 }

</bundles_post_ra>
